<compile_context>
chip_gen: v6e
topology: v6e:2x2x1
jax: 0.10.0
libtpu: 0.0.40
codegen_flags: <defaults>
</compile_context>

<pallas_src>
import functools

import jax
import jax.numpy as jnp
from jax.experimental import pallas as pl
from jax.experimental.pallas import tpu as pltpu


def _decoder_mlp_kernel(z_ref, w1_ref, b1_ref, w2_ref, b2_ref, o_ref):
    # Fused 2-layer MLP: sigmoid(tanh(z @ W1 + b1) @ W2 + b2)
    # Layer 1: MXU matmul in the streaming dtype, f32 accumulation.
    h = jnp.dot(z_ref[...], w1_ref[...], preferred_element_type=jnp.float32)
    h = jnp.tanh(h + b1_ref[...])  # bias add (VPU) + tanh (EUP) in f32
    # Layer 2: feed the MXU in the weight dtype (bf16 on the fast path).
    h = h.astype(w2_ref.dtype)
    o = jnp.dot(h, w2_ref[...], preferred_element_type=jnp.float32) + b2_ref[...]
    # sigmoid(x) == 0.5 * tanh(0.5 * x) + 0.5  (tanh stays on the EUP slot;
    # avoids the full-precision divide that jax.nn.sigmoid lowers to).
    o = 0.5 * jnp.tanh(0.5 * o) + 0.5
    o_ref[...] = o.astype(o_ref.dtype)


def _round_up(x, m):
    return ((x + m - 1) // m) * m


@functools.partial(jax.jit, static_argnames=("batch_tile", "io_dtype"))
def decoder_conv_forward(z, w1, b1, w2, b2, *, batch_tile=512,
                         io_dtype=jnp.bfloat16):
    """z: (B, latent_dim) -> (B, output_width) in io_dtype.

    batch_tile: max rows per grid step (default 512: multiple of 256 for
                v6e/v7x MXU, of 128 for v5e; amortizes the ~0.35us/step cost).
    io_dtype:   dtype streamed through HBM for z / weights / output
                (bf16 halves streamed bytes on this HBM-bound kernel; use
                jnp.float32 for bit-faithful f32 semantics).
    """
    B, latent_dim = z.shape
    hidden = w1.shape[1]
    out_w = w2.shape[1]

    # Choose the batch tile:
    #   * cap at batch_tile
    #   * always a multiple of 8 (sublane granularity)
    #   * keep >=2 grid steps when the batch allows it, so the "parallel"
    #     grid axis can shard across v7x's two TensorCores.
    if B >= 2 * batch_tile:
        bt = batch_tile
    elif B > 8:
        bt = min(batch_tile, _round_up(-(-B // 2), 8))
    else:
        bt = 8

    B_pad = _round_up(B, bt)

    # Cast at the HBM boundary; biases stay f32 (added after f32 accumulate).
    z_io = z.astype(io_dtype)
    w1_io = w1.astype(io_dtype)
    w2_io = w2.astype(io_dtype)
    b1_f32 = b1.astype(jnp.float32)
    b2_f32 = b2.astype(jnp.float32)
    if B_pad != B:
        z_io = jnp.pad(z_io, ((0, B_pad - B), (0, 0)))

    grid = (B_pad // bt,)
    out = pl.pallas_call(
        _decoder_mlp_kernel,
        out_shape=jax.ShapeDtypeStruct((B_pad, out_w), io_dtype),
        grid_spec=pltpu.PrefetchScalarGridSpec(
            num_scalar_prefetch=0,
            grid=grid,
            in_specs=[
                pl.BlockSpec((bt, latent_dim), lambda i: (i, 0)),
                # Weight/bias blocks have constant block indices, so Pallas
                # keeps them resident in VMEM instead of re-DMAing per step.
                pl.BlockSpec((latent_dim, hidden), lambda i: (0, 0)),
                pl.BlockSpec((1, hidden), lambda i: (0, 0)),
                pl.BlockSpec((hidden, out_w), lambda i: (0, 0)),
                pl.BlockSpec((1, out_w), lambda i: (0, 0)),
            ],
            out_specs=pl.BlockSpec((bt, out_w), lambda i: (i, 0)),
        ),
        compiler_params=pltpu.CompilerParams(
            dimension_semantics=("parallel",),
        ),
    )(z_io, w1_io, b1_f32, w2_io, b2_f32)

    return out[:B] if B_pad != B else out


def init_params(key, latent_dim, hidden_dim, output_width):
    """Deterministic synthetic params, matching nn.Linear shapes (transposed)."""
    k1, k2, k3, k4 = jax.random.split(key, 4)
    # PyTorch nn.Linear(in, out): weight (out, in), bias (out,).
    # We store W as (in, out) so the kernel does x @ W.
    lim1 = 1.0 / jnp.sqrt(latent_dim)
    lim2 = 1.0 / jnp.sqrt(hidden_dim)
    w1 = jax.random.uniform(k1, (latent_dim, hidden_dim), jnp.float32, -lim1, lim1)
    b1 = jax.random.uniform(k2, (1, hidden_dim), jnp.float32, -lim1, lim1)
    w2 = jax.random.uniform(k3, (hidden_dim, output_width), jnp.float32, -lim2, lim2)
    b2 = jax.random.uniform(k4, (1, output_width), jnp.float32, -lim2, lim2)
    return w1, b1, w2, b2


def reference_forward(z, w1, b1, w2, b2):
    h = jnp.tanh(z @ w1 + b1)
    return jax.nn.sigmoid(h @ w2 + b2)


if __name__ == "__main__":
    # Config (DecoderConv defaults): midi_width=128, include_durations=False
    # -> output_width=128; hidden_dims=[128]; small latent_dim.
    latent_dim = 32
    hidden_dim = 128
    output_width = 128  # midi_width
    batch = 16

    key = jax.random.PRNGKey(0)
    kz, kp = jax.random.split(key)
    z = jax.random.normal(kz, (batch, latent_dim), jnp.float32)
    w1, b1, w2, b2 = init_params(kp, latent_dim, hidden_dim, output_width)
    ref = reference_forward(z, w1, b1, w2, b2)

    # Fast path: bf16 HBM streaming (default). Loose tolerance vs f32 ref.
    out_bf16 = decoder_conv_forward(z, w1, b1, w2, b2)
    out_bf16 = jax.block_until_ready(out_bf16)
    assert out_bf16.shape == (batch, output_width)
    assert out_bf16.dtype == jnp.bfloat16
    assert jnp.allclose(out_bf16.astype(jnp.float32), ref, atol=3e-2), \
        "bf16 mismatch vs reference"

    # Exact path: f32 I/O matches the PyTorch module numerics tightly.
    out_f32 = decoder_conv_forward(z, w1, b1, w2, b2, io_dtype=jnp.float32)
    out_f32 = jax.block_until_ready(out_f32)
    assert out_f32.shape == (batch, output_width)
    assert jnp.allclose(out_f32, ref, atol=1e-5, rtol=1e-5), \
        "f32 mismatch vs reference"

    # Ragged batch: exercises the pad-and-slice path (B not a tile multiple).
    out_r = decoder_conv_forward(z[:13], w1, b1, w2, b2, io_dtype=jnp.float32)
    out_r = jax.block_until_ready(out_r)
    assert out_r.shape == (13, output_width)
    assert jnp.allclose(out_r, ref[:13], atol=1e-5, rtol=1e-5), \
        "ragged-batch mismatch vs reference"

    print("KERNEL_OK")
</pallas_src>

<mosaic_0001>
module attributes {stable_mosaic.version = 11 : i64} {
  func.func @_decoder_mlp_kernel(%arg0: i32, %arg1: memref<8x32xbf16, #tpu.memory_space<vmem>>, %arg2: memref<32x128xbf16, #tpu.memory_space<vmem>>, %arg3: memref<1x128xf32, #tpu.memory_space<vmem>>, %arg4: memref<128x128xbf16, #tpu.memory_space<vmem>>, %arg5: memref<1x128xf32, #tpu.memory_space<vmem>>, %arg6: memref<8x128xbf16, #tpu.memory_space<vmem>>) attributes {dimension_semantics = [#tpu.dimension_semantics<parallel>], iteration_bounds = array<i64: 2>, scalar_prefetch = 0 : i64, scratch_operands = 0 : i64, tpu.core_type = #tpu.core_type<tc>, window_params = [{transform_indices = @transform_0, window_bounds = array<i64: 8, 32>}, {pipeline_mode = #tpu.pipeline_mode<synchronous>, transform_indices = @transform_1, window_bounds = array<i64: 32, 128>}, {pipeline_mode = #tpu.pipeline_mode<synchronous>, transform_indices = @transform_2, window_bounds = array<i64: 1, 128>}, {pipeline_mode = #tpu.pipeline_mode<synchronous>, transform_indices = @transform_3, window_bounds = array<i64: 128, 128>}, {pipeline_mode = #tpu.pipeline_mode<synchronous>, transform_indices = @transform_4, window_bounds = array<i64: 1, 128>}, {transform_indices = @transform_5, window_bounds = array<i64: 8, 128>}]} {
    %c0 = arith.constant 0 : index
    %c0_0 = arith.constant 0 : index
    %0 = vector.load %arg1[%c0, %c0_0] : memref<8x32xbf16, #tpu.memory_space<vmem>>, vector<8x32xbf16>
    %c0_1 = arith.constant 0 : index
    %c0_2 = arith.constant 0 : index
    %1 = vector.load %arg2[%c0_1, %c0_2] : memref<32x128xbf16, #tpu.memory_space<vmem>>, vector<32x128xbf16>
    %cst = arith.constant dense<0.000000e+00> : vector<8x128xf32>
    %2 = tpu.matmul %0, %1, %cst {dimension_numbers = #tpu.dot_dimension_numbers<[1], [0], [0], [1], [0, 0, 1, 1], [], []>} : vector<8x32xbf16>, vector<32x128xbf16>, vector<8x128xf32> -> vector<8x128xf32>
    %c0_3 = arith.constant 0 : index
    %c0_4 = arith.constant 0 : index
    %3 = vector.load %arg3[%c0_3, %c0_4] : memref<1x128xf32, #tpu.memory_space<vmem>>, vector<1x128xf32>
    %4 = vector.broadcast %3 : vector<1x128xf32> to vector<8x128xf32>
    %5 = arith.addf %2, %4 : vector<8x128xf32>
    %6 = math.tanh %5 : vector<8x128xf32>
    %7 = arith.truncf %6 : vector<8x128xf32> to vector<8x128xbf16>
    %c0_5 = arith.constant 0 : index
    %c0_6 = arith.constant 0 : index
    %8 = vector.load %arg4[%c0_5, %c0_6] : memref<128x128xbf16, #tpu.memory_space<vmem>>, vector<128x128xbf16>
    %cst_7 = arith.constant dense<0.000000e+00> : vector<8x128xf32>
    %9 = tpu.matmul %7, %8, %cst_7 {dimension_numbers = #tpu.dot_dimension_numbers<[1], [0], [0], [1], [0, 0, 1, 1], [], []>} : vector<8x128xbf16>, vector<128x128xbf16>, vector<8x128xf32> -> vector<8x128xf32>
    %c0_8 = arith.constant 0 : index
    %c0_9 = arith.constant 0 : index
    %10 = vector.load %arg5[%c0_8, %c0_9] : memref<1x128xf32, #tpu.memory_space<vmem>>, vector<1x128xf32>
    %11 = vector.broadcast %10 : vector<1x128xf32> to vector<8x128xf32>
    %12 = arith.addf %9, %11 : vector<8x128xf32>
    %cst_10 = arith.constant 5.000000e-01 : f32
    %13 = vector.broadcast %cst_10 : f32 to vector<8x128xf32>
    %14 = arith.mulf %13, %12 : vector<8x128xf32>
    %15 = math.tanh %14 : vector<8x128xf32>
    %cst_11 = arith.constant 5.000000e-01 : f32
    %16 = vector.broadcast %cst_11 : f32 to vector<8x128xf32>
    %17 = arith.mulf %16, %15 : vector<8x128xf32>
    %cst_12 = arith.constant 5.000000e-01 : f32
    %18 = vector.broadcast %cst_12 : f32 to vector<8x128xf32>
    %19 = arith.addf %17, %18 : vector<8x128xf32>
    %20 = arith.truncf %19 : vector<8x128xf32> to vector<8x128xbf16>
    %c0_13 = arith.constant 0 : index
    %c0_14 = arith.constant 0 : index
    %21 = vector.load %arg6[%c0_13, %c0_14] : memref<8x128xbf16, #tpu.memory_space<vmem>>, vector<8x128xbf16>
    tpu.vector_store %arg6[%c0_13, %c0_14], %20 {strides = array<i32>} : memref<8x128xbf16, #tpu.memory_space<vmem>>, vector<8x128xbf16>,
    return
  }
  func.func @transform_0(%arg0: i32) -> (i32, i32) {
    %c0_i32 = arith.constant 0 : i32
    %c0_i32_0 = arith.constant 0 : i32
    return %arg0, %c0_i32 : i32, i32
  }
  func.func @transform_1(%arg0: i32) -> (i32, i32) {
    %c0_i32 = arith.constant 0 : i32
    %c0_i32_0 = arith.constant 0 : i32
    %c0_i32_1 = arith.constant 0 : i32
    return %c0_i32, %c0_i32_0 : i32, i32
  }
  func.func @transform_2(%arg0: i32) -> (i32, i32) {
    %c0_i32 = arith.constant 0 : i32
    %c0_i32_0 = arith.constant 0 : i32
    %c0_i32_1 = arith.constant 0 : i32
    return %c0_i32, %c0_i32_0 : i32, i32
  }
  func.func @transform_3(%arg0: i32) -> (i32, i32) {
    %c0_i32 = arith.constant 0 : i32
    %c0_i32_0 = arith.constant 0 : i32
    %c0_i32_1 = arith.constant 0 : i32
    return %c0_i32, %c0_i32_0 : i32, i32
  }
  func.func @transform_4(%arg0: i32) -> (i32, i32) {
    %c0_i32 = arith.constant 0 : i32
    %c0_i32_0 = arith.constant 0 : i32
    %c0_i32_1 = arith.constant 0 : i32
    return %c0_i32, %c0_i32_0 : i32, i32
  }
  func.func @transform_5(%arg0: i32) -> (i32, i32) {
    %c0_i32 = arith.constant 0 : i32
    %c0_i32_0 = arith.constant 0 : i32
    return %arg0, %c0_i32 : i32, i32
  }
}

</mosaic_0001>

<bundles_post_ra>
// kernel: decoder_conv_forward.1
= control target key start
LH: loop header
LB: loop body
LE: loop exit
PB: predicated region body
PF: predicated region fallthrough
CT: control target
= control target key end

     0   :  { %10 = vsyncpa [#allocation3], 0  ;;  %s817_s0 = inlined_call_operand.vmem [shape: bf16[16,32], index: 0, kind: input, shape index: {}]   ;;  %s818_s1 = inlined_call_operand.vmem [shape: bf16[32,128], index: 1, kind: input, shape index: {}]   ;;  %s819_s2 = inlined_call_operand.vmem [shape: f32[1,128], index: 2, kind: input, shape index: {}]   ;;  %s820_s3 = inlined_call_operand.vmem [shape: bf16[128,128], index: 3, kind: input, shape index: {}]   ;;  %s821_s4 = inlined_call_operand.vmem [shape: f32[1,128], index: 4, kind: input, shape index: {}]   ;;  %s822_s5 = inlined_call_operand.hbm [shape: bf16[16,128], index: 5, kind: output, shape index: {}]  }
   0x1   :  { %12 = vsyncpa [#allocation3 + $0x1], 0  ;;  %s694_s18 = smov 0   ;;  %s696_s19 = smov 0  }
   0x2   :  { %s698_s20 = smov 0   ;;  %s700_s21 = smov 0  }
   0x3 LB: > { %s715_s22 = sadd.s32 4294967295, %s659_s21   ;;  %s481_s23 = sadd.s32 4294967294, %s659_s21   ;;  %s659_s21 = sphi %s700_s21, %s828_s21   ;;  %s655_s20 = sphi %s698_s20, %s827_s20   ;;  %s651_s19 = sphi %s696_s19, %s826_s19   ;;  %s647_s18 = sphi %s694_s18, %s825_s18  }
   0x4   : > { %s719_s24 = sadd.s32 1, %s659_s21   ;;  %s135_s25 = sadd.s32 1, %s655_s20 }
   0x5   : > { %s132_s26 = ssub.s32 %s659_s21, %s719_s24  ;;  %p145_p0 = scmp.ne.s32.totalorder %s655_s20, %s651_s19 }
   0x6   : > { %p133_p1 = scmp.eq.s32.totalorder %s132_s26, 0  ;;  %p146_p2 = scmp.eq.s32.totalorder %s715_s22, 1 }
   0x7   : > { %p151_p3 = scmp.ne.s32.totalorder %s651_s19, %s647_s18  ;;  %p152_p4 = scmp.eq.s32.totalorder %s481_s23, 1 }
   0x8   : > { %s730_s27 = scalar_select %p133_p1, %s655_s20, %s135_s25  }
   0x9   : > { %p732_p5 = por %p146_p2, %p145_p0  ;;  %p736_p6 = por %p152_p4, %p151_p3 }
   0xa   : > { %p484_p7 = scmp.ge.s32.totalorder %s659_s21, 1  ;;  %p189_p8 = scmp.lt.s32.totalorder %s659_s21, 3 }
   0xc   : > { %p190_p9 = pnand %p484_p7, %p189_p8 }
   0xd   : > { %p216_p10 = scmp.lt.s32.totalorder (!%p190_p9), %s715_s22, 1  ;;  %s213_s23 = sand.u32 (!%p190_p9), 1, %s651_s19  }
   0xe   : > { %193 = sbr.rel (%p190_p9) target bundleno = 469 (0x1d5), region = 40  ;;  %s485_s25 = sshll.u32 (!%p190_p9), %s213_s23, 2 }
   0xf   : > { %s501_s26 = sshll.u32 (!%p190_p9), %s715_s22, 6  ;;  %s215_s30 = scalar_lea.vmem (!%p190_p9), [#allocation2], %s485_s25 }
  0x10   : > { %s422_s6 = sshll.u32 (!%p190_p9), %s215_s30, 4  ;;  %s420_s9 = scalar_lea.hbm (!%p190_p9), %s822_s5, %s501_s26  ;;  %s423_s6 = int_to_ptr.vmem [resolvable:$true] %s422_s6 }
  0x11   : > { %s409_s10 = scalar_lea.sflag (!%p190_p9), [#allocation3], %s213_s23  ;;  %s663_s12 = smov (!%p190_p9), [#allocation2]  }
  0x12   : > { %s603_s13 = sshll.u32 (!%p190_p9), %s663_s12, 4  ;;  %s604_s13 = int_to_ptr.vmem [resolvable:$false] %s603_s13 }
  0x13   : > { %v585_v0 = vld [vmem:[%s818_s1 + $0x8] sm:$0xff]   ;;  %v661_v1 = vmov 0.0   ;;  %v586_v2 = vld [vmem:[%s818_s1] sm:$0xff]   ;;  %vm662_vm0 = vmmov 0   ;;  %v587_v3 = vld [vmem:[%s820_s3 + $0x38] sm:$0xff]   ;;  %s217_s11 = scalar_select %p216_p10, %s715_s22, 1 }
  0x14   : > { %516 = vmatprep.subr.bf16.mxu0 %v661_v1  ;;  %524 = vmatprep.subr.bf16.mxu1 %v661_v1  ;;  %v588_v4 = vld [vmem:[%s820_s3 + $0x30] sm:$0xff]   ;;  %vm245_vm1 = vcmask 261120   ;;  %v589_v6 = vld [vmem:[%s820_s3 + $0x28] sm:$0xff]   ;;  %v590_v7 = vld [vmem:[%s820_s3 + $0x20] sm:$0xff]   ;;  %s605_s22 = scalar_lea.vmem %s604_s13, 128  ;;  %p606_p0 = scmp.lt.s32.totalorder %s423_s6, %s604_s13 }
  0x15   : > { %517 = vmatpush3.bf16.msra.mxu0 %v585_v0  ;;  %520 = vmatprep.mubr.msk.bf16.mxu0 %vm662_vm0, %v661_v1  ;;  %s486_s14 = sshll.u32 %s217_s11, 2  ;;  %v591_v8 = vld [vmem:[%s820_s3 + $0x18] sm:$0xff]   ;;  %v592_v9 = vld [vmem:[%s820_s3 + $0x10] sm:$0xff]   ;;  %v593_v10 = vld [vmem:[%s820_s3 + $0x8] sm:$0xff]   ;;  %s599_s11 = scalar_lea.vmem %s423_s6, 64 }
  0x16   : > { %518 = vmatprep.subr.bf16.mxu0 %v661_v1  ;;  %540 = vmatprep.mubr.msk.bf16.mxu1 %vm662_vm0, %v661_v1  ;;  %s219_s17 = scalar_lea.vmem %s817_s0, %s486_s14  ;;  %v594_v11 = vld [vmem:[%s820_s3] sm:$0xff]   ;;  %p600_p11 = scmp.ne.s32.totalorder %s423_s6, %s599_s11 }
  0x17   : > { %525 = vmatpush3.bf16.msra.mxu1 %v587_v3  ;;  %v221_v5 = vld [vmem:[%s219_s17] sm:$0xf]  ;;  %p607_p1 = scmp.lt.s32.totalorder %s605_s22, %s599_s11 }
  0x18   : > { %526 = vmatprep.subr.bf16.mxu1 %v661_v1  ;;  %v487_v12 = vld [vmem:[%s819_s2] ss:$0 sm:$0xff]  ;;  %p601_p12 = pnand %p600_p11, %p732_p5 }
  0x19   : > { %519 = vmatpush3.bf16.msra.mxu0 %v586_v2  ;;  %v491_v20 = vld [vmem:[%s821_s4] ss:$0 sm:$0xff]  ;;  %p608_p2 = por %p607_p1, %p606_p0 }
  0x1a   : > { %p602_p13 = pneg %p601_p12 }
  0x1b   : > { %527 = vmatpush3.bf16.msra.mxu1 %v588_v4 }
  0x1c   : > { %521 = vmatmul.mubr.msk.bf16.vlgmr.msra.gmra.mxu0 %vm245_vm1, %v221_v5  ;;  %528 = vmatprep.subr.bf16.mxu1 %v661_v1  ;;  %p609_p3 = pnand %p608_p2, %p602_p13 }
  0x1f   : > { %529 = vmatpush3.bf16.msra.mxu1 %v589_v6 }
  0x20   : > { %530 = vmatprep.subr.bf16.mxu1 %v661_v1 }
  0x23   : > { %531 = vmatpush3.bf16.msra.mxu1 %v590_v7 }
  0x24   : > { %532 = vmatprep.subr.bf16.mxu1 %v661_v1 }
  0x27   : > { %533 = vmatpush3.bf16.msra.mxu1 %v591_v8 }
  0x28   : > { %534 = vmatprep.subr.bf16.mxu1 %v661_v1 }
  0x2b   : > { %535 = vmatpush3.bf16.msra.mxu1 %v592_v9 }
  0x2c   : > { %536 = vmatprep.subr.bf16.mxu1 %v661_v1 }
  0x2f   : > { %537 = vmatpush3.bf16.msra.mxu1 %v593_v10 }
  0x30   : > { %538 = vmatprep.subr.bf16.mxu1 %v661_v1 }
  0x33   : > { %539 = vmatpush3.bf16.msra.mxu1 %v594_v11 }
  0xdc   : > { %v283_v13 = vpop.f32.mrf.mxu0 }
  0xdd   : > { %v284_v14 = vadd.f32 %v487_v12, %v283_v13 }
  0xde   : > { %v522_v15 = vpop.f32.mrf.mxu0 }
  0xdf   : > { %595 = vtanh.f32 %v284_v14 }
  0xe0   : > { %v286_v16 = vpop.f32.mrf.mxu0 }
  0xe2   : > { %v523_v17 = vpop.f32.mrf.mxu0 }
  0xec   : > { %v596_v18 = vpop.eup %595 }
  0xed   : > { %v290_v19 = vpack.c.bf16 %v596_v18, %v596_v18 }
  0xef   : > { %541 = vmatmul.mubr.bf16.vlgmr.msra.gmra.mxu1 %v290_v19 }
 0x1af   : > { %v396_v21 = vpop.f32.mrf.mxu1 }
 0x1b0   : > { %v397_v22 = vadd.f32 %v491_v20, %v396_v21 }
 0x1b1   : > { %v542_v23 = vpop.f32.mrf.mxu1 }
 0x1b2   : > { %v402_v24 = vmul.f32 0.5, %v397_v22 }
 0x1b3   : > { %v399_v25 = vpop.f32.mrf.mxu1 }
 0x1b4   : > { %597 = vtanh.f32 %v402_v24 }
 0x1b5   : > { %v543_v26 = vpop.f32.mrf.mxu1 }
 0x1c1   : > { %v598_v27 = vpop.eup %597 }
 0x1c2   : > { %v404_v28 = vmul.f32 0.5, %v598_v27 }
 0x1c4   : > { %v405_v29 = vadd.f32 0.5, %v404_v28 }
 0x1c6   : > { %v406_v30 = vpack.c.bf16 %v405_v29, %v405_v29 }
 0x1c8   : > { %407 = vst [vmem:[%s215_s30] sm:$0xf] %v406_v30 }
 0x1c9   : > { %612 = shalt.err (!%p609_p3)
}
 0x1ca   : > { %s613_s14 = scalar_lea.hbm %s420_s9, 64  ;;  %s617_s17 = scalar_lea.hbm %s822_s5, 128 }
 0x1cb   : > { %p614_p4 = scmp.ne.s32.totalorder %s420_s9, %s613_s14  ;;  %p618_p9 = scmp.lt.s32.totalorder %s420_s9, %s822_s5 }
 0x1cc   : > { %p619_p10 = scmp.lt.s32.totalorder %s617_s17, %s613_s14 }
 0x1cd   : > { %p615_p7 = pnand %p614_p4, %p732_p5 }
 0x1ce   : > { %p620_p11 = por %p619_p10, %p618_p9 }
 0x1cf   : > { %p616_p8 = pneg %p615_p7 }
 0x1d1   : > { %p621_p12 = pnand %p620_p11, %p616_p8 }
 0x1d3   : > { %624 = shalt.err (!%p621_p12)
}
 0x1d4   : > { %544 = dma.vmem_to_hbm [thread:$0]  (%p732_p5), %s423_s6, 64, %s420_s9, %s409_s10  }
 0x1d5 PF: > { %p550_p13 = scmp.ge.s32.totalorder %s659_s21, 2  ;;  %s434_s26 = sand.u32 1, %s647_s18  }
 0x1d6   : > { %s435_s30 = scalar_lea.sflag [#allocation3], %s434_s26 }
 0x1d7   : > { %p547_p0 = pnand %p550_p13, %p736_p6 }
 0x1d9   : > { %p548_p1 = pneg %p547_p0 }
 0x1db   : > { %642 = dma.done.wait (%p548_p1), %s435_s30, 64  }
 0x1dc   : > { %644 = vsyncadd (%p548_p1), %s435_s30, 4294967232  ;;  %p15_p2 = scmp.ge.s32.totalorder %s719_s24, 4   ;;  %s825_s18 = smov %s651_s19 }
 0x1dd   : > { %s826_s19 = smov %s655_s20  ;;  %s827_s20 = smov %s730_s27 }
 0x1de   : > { %s828_s21 = smov %s719_s24  ;;  %17 = sbr.rel (!%p15_p2) target bundleno = 3 (0x3), region = 75 }
 0x1e3   :  { %440 = vsyncpa [#allocation3], 1 }
 0x1e4   :  { %442 = vsyncpa [#allocation3 + $0x1], 1 }

</bundles_post_ra>
